<compile_context>
chip_gen: v6e
topology: v6e:2x2x1
jax: 0.10.0
libtpu: 0.0.40
codegen_flags: <defaults>
</compile_context>

<pallas_src>
import functools

import jax
import jax.numpy as jnp
import numpy as np
from jax import lax
from jax.experimental import pallas as pl
from jax.experimental.pallas import tpu as pltpu

EPS = 1e-5  # PyTorch InstanceNorm2d default eps


def _drf_kernel(x_ref, w1_ref, w2_ref, masks_ref, out_ref, stack_ref, x1_ref,
                *, K, H, W, BBLK, shifts, needs_mask):
    # x_ref     : [BBLK, Cin,  H*W]        (input block)
    # w1_ref    : [Cout, Cin]              (1x1 conv weight, f32)
    # w2_ref    : [Cout, K*K*Cout]         (dilated conv weight, bf16, (kh,kw,ci) order)
    # masks_ref : [K*K, H*W]               (per-tap boundary-validity masks, f32)
    # out_ref   : [BBLK, Cout, H*W]
    # stack_ref : [K*K*Cout, BBLK*H*W]     (bf16 VMEM scratch: stacked shifted taps)
    # x1_ref    : [Cout, BBLK*H*W]         (f32 VMEM scratch: x1 for the residual add)
    Cout, Cin = w1_ref.shape
    HW = H * W
    KK = K * K

    w1 = w1_ref[...].astype(jnp.float32)                               # [Cout, Cin]
    # Hoisted lane-broadcasts of the 1x1 weight columns (JAX does not CSE them).
    if Cin <= 8:
        w1_cols = [jnp.broadcast_to(w1[:, ci:ci + 1], (Cout, HW)) for ci in range(Cin)]
    else:
        w1_cols = None

    for b in range(BBLK):  # small static unroll over the images of this block
        xb = x_ref[b].astype(jnp.float32)                              # [Cin, HW]

        # ---- 1x1 conv ----
        if w1_cols is not None:
            # Tiny Cin: VPU broadcast multiply-adds (no MXU push/drain latency).
            x1b = w1_cols[0] * xb[0:1, :]
            for ci in range(1, Cin):
                x1b = x1b + w1_cols[ci] * xb[ci:ci + 1, :]             # [Cout, HW]
        else:
            x1b = jnp.dot(w1, xb, preferred_element_type=jnp.float32)  # [Cout, HW]

        # Stage x1 to VMEM: needed for the residual add after the block matmul,
        # and keeps vreg live ranges bounded across the unrolled loop.
        x1_ref[:, b * HW:(b + 1) * HW] = x1b

        # ---- InstanceNorm2d (affine=False), f32 statistics over the lane axis ----
        s = jnp.sum(x1b, axis=1, keepdims=True)
        ss = jnp.sum(x1b * x1b, axis=1, keepdims=True)
        mean = s * (1.0 / HW)
        var = jnp.maximum(ss * (1.0 / HW) - mean * mean, 0.0)
        xn = (x1b - mean) * lax.rsqrt(var + EPS)                       # [Cout, HW]

        # ---- build the K*K shifted / masked taps for this image ----
        # out[co,p] = sum_{tap,ci} w2[co,tap,ci] * xn[ci, p + (ki*dil-pad)*W + (kj*dil-pad)]
        # (zero where the 2D shift leaves the image -> boundary mask).
        for tap in range(KK):
            sh = shifts[tap]
            val = xn if sh == 0 else jnp.roll(xn, sh, axis=1)
            if needs_mask[tap]:
                val = val * masks_ref[tap:tap + 1, :]
            stack_ref[tap * Cout:(tap + 1) * Cout, b * HW:(b + 1) * HW] = (
                val.astype(stack_ref.dtype))

    # ---- ONE MXU matmul for the dilated conv over the whole block (bf16 x bf16 -> f32) ----
    x2 = jnp.dot(w2_ref[...], stack_ref[...],
                 preferred_element_type=jnp.float32)                   # [Cout, BBLK*HW]

    # ---- tanh(x2) then tanh(x1 + tanh(x2)), lane-dense over the whole block ----
    out = jnp.tanh(x1_ref[...] + jnp.tanh(x2))                         # [Cout, BBLK*HW]
    for b in range(BBLK):
        out_ref[b] = out[:, b * HW:(b + 1) * HW].astype(out_ref.dtype)


def drf_block(x_nchw, w1_torch, w2_torch, *, kernel, pad_rate, atrous_rate):
    """x_nchw: [N, Cin, H, W]; w1_torch: [Cout, Cin, 1, 1]; w2_torch: [Cout, Cout, K, K]."""
    N, Cin, H, W = x_nchw.shape
    Cout = w2_torch.shape[0]
    K = kernel

    # This kernel assumes "same" spatial output size (the configuration DRFBlock
    # is used with); other pad/dilation combos change PyTorch's output shape.
    assert 2 * pad_rate == atrous_rate * (K - 1), (
        "drf_block only supports pad_rate == atrous_rate*(kernel-1)/2 ('same' output)")

    HW = H * W
    x = x_nchw.reshape(N, Cin, HW)                     # free reshape, no transpose
    w1 = w1_torch[:, :, 0, 0].astype(jnp.float32)      # [Cout, Cin]
    # w2_flat[co, (ki*K+kj)*Cout + ci] = w2_torch[co, ci, ki, kj]; bf16 for native MXU path.
    w2 = (jnp.transpose(w2_torch, (0, 2, 3, 1))
          .reshape(Cout, K * K * Cout).astype(jnp.bfloat16))

    # Static per-tap shifts and boundary masks (host-side numpy, passed as an
    # input array so the kernel captures no array constants).
    ii = np.arange(HW) // W
    jj = np.arange(HW) % W
    masks_np = np.ones((K * K, HW), np.float32)
    shifts, needs_mask = [], []
    for ki in range(K):
        for kj in range(K):
            di = ki * atrous_rate - pad_rate
            dj = kj * atrous_rate - pad_rate
            valid = ((ii + di >= 0) & (ii + di < H) & (jj + dj >= 0) & (jj + dj < W))
            masks_np[ki * K + kj] = valid.astype(np.float32)
            shifts.append(int((-(di * W + dj)) % HW))
            needs_mask.append(bool(not valid.all()))
    masks = jnp.asarray(masks_np)

    # Batch-block heuristic: amortize per-step overhead, but keep >= 2 grid
    # steps so both v7x TensorCores get work and DMA double-buffering overlaps.
    bblk = 1
    for cand in (8, 4, 2, 1):
        if N % cand == 0 and N // cand >= 2:
            bblk = cand
            break
    grid = (N // bblk,)

    # Explicit VMEM budget: 2x double-buffered in/out blocks + resident weights/masks
    # + scratch; clamp for v7x's 64 MiB physical VMEM.
    est = (2 * (bblk * Cin * HW * 4 + bblk * Cout * HW * 4
                + Cout * Cin * 4 + Cout * K * K * Cout * 2 + K * K * HW * 4)
           + K * K * Cout * bblk * HW * 2     # bf16 tap stack
           + Cout * bblk * HW * 4)            # f32 x1 residual
    vmem_limit = int(min(max(2 * est, 16 << 20), 64 << 20))
    # TODO(synk): for large H*W, tile spatially (row blocks + dilation halo,
    # two-pass InstanceNorm) so tiles also fit v7x's 64 MiB VMEM.

    kern = functools.partial(_drf_kernel, K=K, H=H, W=W, BBLK=bblk,
                             shifts=tuple(shifts), needs_mask=tuple(needs_mask))
    out = pl.pallas_call(
        kern,
        out_shape=jax.ShapeDtypeStruct((N, Cout, HW), x_nchw.dtype),
        grid_spec=pltpu.PrefetchScalarGridSpec(
            num_scalar_prefetch=0,
            grid=grid,
            in_specs=[
                pl.BlockSpec((bblk, Cin, HW), lambda n: (n, 0, 0)),
                pl.BlockSpec((Cout, Cin), lambda n: (0, 0)),
                pl.BlockSpec((Cout, K * K * Cout), lambda n: (0, 0)),
                pl.BlockSpec((K * K, HW), lambda n: (0, 0)),
            ],
            out_specs=pl.BlockSpec((bblk, Cout, HW), lambda n: (n, 0, 0)),
            scratch_shapes=[
                pltpu.VMEM((K * K * Cout, bblk * HW), jnp.bfloat16),  # stacked taps
                pltpu.VMEM((Cout, bblk * HW), jnp.float32),           # x1 residual
            ],
        ),
        compiler_params=pltpu.CompilerParams(
            dimension_semantics=("parallel",),
            vmem_limit_bytes=vmem_limit,
        ),
    )(x, w1, w2, masks)
    return out.reshape(N, Cout, H, W)


def drf_block_ref(x, w1_torch, w2_torch, *, kernel, pad_rate, atrous_rate):
    """Pure-JAX reference mirroring the PyTorch forward exactly (NCHW, f32)."""
    dn = ("NCHW", "OIHW", "NCHW")
    x1 = lax.conv_general_dilated(x, w1_torch, (1, 1), "VALID", dimension_numbers=dn)
    mean = jnp.mean(x1, axis=(2, 3), keepdims=True)
    var = jnp.mean((x1 - mean) ** 2, axis=(2, 3), keepdims=True)
    xn = (x1 - mean) / jnp.sqrt(var + EPS)
    x2 = lax.conv_general_dilated(
        xn, w2_torch, (1, 1),
        [(pad_rate, pad_rate), (pad_rate, pad_rate)],
        rhs_dilation=(atrous_rate, atrous_rate),
        dimension_numbers=dn,
    )
    # block = InstanceNorm -> conv -> Tanh, then outer tanh(x1 + x2)
    return jnp.tanh(x1 + jnp.tanh(x2))


if __name__ == "__main__":
    # Shapes consistent with DRFBlock(in=4, out=8, kernel=3, pad=2, dilation=2)
    N, Cin, Cout, H, W = 2, 4, 8, 16, 16
    kernel, pad_rate, atrous_rate = 3, 2, 2   # pad = dilation*(k-1)/2 -> same spatial size

    key = jax.random.PRNGKey(0)
    kx, k1, k2 = jax.random.split(key, 3)
    x = jax.random.normal(kx, (N, Cin, H, W), jnp.float32)
    w1_torch = jax.random.normal(k1, (Cout, Cin, 1, 1), jnp.float32) / np.sqrt(Cin)
    w2_torch = jax.random.normal(k2, (Cout, Cout, kernel, kernel), jnp.float32) / np.sqrt(
        Cout * kernel * kernel)

    out = drf_block(x, w1_torch, w2_torch,
                    kernel=kernel, pad_rate=pad_rate, atrous_rate=atrous_rate)
    out = jax.block_until_ready(out)

    ref = drf_block_ref(x, w1_torch, w2_torch,
                        kernel=kernel, pad_rate=pad_rate, atrous_rate=atrous_rate)
    # Tolerance sized for bf16 MXU operands on the dilated-conv matmul
    # (stats / residual path stay f32; both tanhs compress the error).
    np.testing.assert_allclose(np.asarray(out), np.asarray(ref), atol=1e-2, rtol=1e-2)
    print("KERNEL_OK")
</pallas_src>

<mosaic_0001>
module attributes {stable_mosaic.version = 11 : i64} {
  func.func @_drf_kernel(%arg0: i32, %arg1: memref<1x4x256xf32, #tpu.memory_space<vmem>>, %arg2: memref<8x4xf32, #tpu.memory_space<vmem>>, %arg3: memref<8x72xbf16, #tpu.memory_space<vmem>>, %arg4: memref<9x256xf32, #tpu.memory_space<vmem>>, %arg5: memref<1x8x256xf32, #tpu.memory_space<vmem>>, %arg6: memref<72x256xbf16, #tpu.memory_space<vmem>>, %arg7: memref<8x256xf32, #tpu.memory_space<vmem>>) attributes {dimension_semantics = [#tpu.dimension_semantics<parallel>], iteration_bounds = array<i64: 2>, scalar_prefetch = 0 : i64, scratch_operands = 2 : i64, tpu.core_type = #tpu.core_type<tc>, window_params = [{transform_indices = @transform_0, window_bounds = array<i64: 1, 4, 256>}, {pipeline_mode = #tpu.pipeline_mode<synchronous>, transform_indices = @transform_1, window_bounds = array<i64: 8, 4>}, {pipeline_mode = #tpu.pipeline_mode<synchronous>, transform_indices = @transform_2, window_bounds = array<i64: 8, 72>}, {pipeline_mode = #tpu.pipeline_mode<synchronous>, transform_indices = @transform_3, window_bounds = array<i64: 9, 256>}, {transform_indices = @transform_4, window_bounds = array<i64: 1, 8, 256>}]} {
    %c0 = arith.constant 0 : index
    %c0_0 = arith.constant 0 : index
    %0 = vector.load %arg2[%c0, %c0_0] : memref<8x4xf32, #tpu.memory_space<vmem>>, vector<8x4xf32>
    %1 = vector.extract_strided_slice %0 {offsets = [0, 0], sizes = [8, 1], strides = [1, 1]} : vector<8x4xf32> to vector<8x1xf32>
    %2 = vector.shape_cast %1 : vector<8x1xf32> to vector<8x1xf32>
    %3 = vector.broadcast %2 : vector<8x1xf32> to vector<8x256xf32>
    %4 = vector.extract_strided_slice %0 {offsets = [0, 1], sizes = [8, 1], strides = [1, 1]} : vector<8x4xf32> to vector<8x1xf32>
    %5 = vector.shape_cast %4 : vector<8x1xf32> to vector<8x1xf32>
    %6 = vector.broadcast %5 : vector<8x1xf32> to vector<8x256xf32>
    %7 = vector.extract_strided_slice %0 {offsets = [0, 2], sizes = [8, 1], strides = [1, 1]} : vector<8x4xf32> to vector<8x1xf32>
    %8 = vector.shape_cast %7 : vector<8x1xf32> to vector<8x1xf32>
    %9 = vector.broadcast %8 : vector<8x1xf32> to vector<8x256xf32>
    %10 = vector.extract_strided_slice %0 {offsets = [0, 3], sizes = [8, 1], strides = [1, 1]} : vector<8x4xf32> to vector<8x1xf32>
    %11 = vector.shape_cast %10 : vector<8x1xf32> to vector<8x1xf32>
    %12 = vector.broadcast %11 : vector<8x1xf32> to vector<8x256xf32>
    %c0_1 = arith.constant 0 : index
    %c0_2 = arith.constant 0 : index
    %c0_3 = arith.constant 0 : index
    %13 = vector.load %arg1[%c0_1, %c0_2, %c0_3] : memref<1x4x256xf32, #tpu.memory_space<vmem>>, vector<1x4x256xf32>
    %14 = vector.shape_cast %13 : vector<1x4x256xf32> to vector<4x256xf32>
    %15 = vector.extract_strided_slice %14 {offsets = [0, 0], sizes = [1, 256], strides = [1, 1]} : vector<4x256xf32> to vector<1x256xf32>
    %16 = vector.broadcast %15 : vector<1x256xf32> to vector<8x256xf32>
    %17 = arith.mulf %3, %16 : vector<8x256xf32>
    %18 = vector.extract_strided_slice %14 {offsets = [1, 0], sizes = [1, 256], strides = [1, 1]} : vector<4x256xf32> to vector<1x256xf32>
    %19 = vector.broadcast %18 : vector<1x256xf32> to vector<8x256xf32>
    %20 = arith.mulf %6, %19 : vector<8x256xf32>
    %21 = arith.addf %17, %20 : vector<8x256xf32>
    %22 = vector.extract_strided_slice %14 {offsets = [2, 0], sizes = [1, 256], strides = [1, 1]} : vector<4x256xf32> to vector<1x256xf32>
    %23 = vector.broadcast %22 : vector<1x256xf32> to vector<8x256xf32>
    %24 = arith.mulf %9, %23 : vector<8x256xf32>
    %25 = arith.addf %21, %24 : vector<8x256xf32>
    %26 = vector.extract_strided_slice %14 {offsets = [3, 0], sizes = [1, 256], strides = [1, 1]} : vector<4x256xf32> to vector<1x256xf32>
    %27 = vector.broadcast %26 : vector<1x256xf32> to vector<8x256xf32>
    %28 = arith.mulf %12, %27 : vector<8x256xf32>
    %29 = arith.addf %25, %28 : vector<8x256xf32>
    %c0_4 = arith.constant 0 : index
    %c0_5 = arith.constant 0 : index
    %30 = vector.load %arg7[%c0_4, %c0_5] : memref<8x256xf32, #tpu.memory_space<vmem>>, vector<8x256xf32>
    tpu.vector_store %arg7[%c0_4, %c0_5], %29 {strides = array<i32>} : memref<8x256xf32, #tpu.memory_space<vmem>>, vector<8x256xf32>,
    %cst = arith.constant dense<0.000000e+00> : vector<8xf32>
    %31 = vector.multi_reduction <add>, %29, %cst [1] : vector<8x256xf32> to vector<8xf32>
    %32 = vector.shape_cast %31 : vector<8xf32> to vector<8x1xf32>
    %33 = arith.mulf %29, %29 : vector<8x256xf32>
    %cst_6 = arith.constant dense<0.000000e+00> : vector<8xf32>
    %34 = vector.multi_reduction <add>, %33, %cst_6 [1] : vector<8x256xf32> to vector<8xf32>
    %35 = vector.shape_cast %34 : vector<8xf32> to vector<8x1xf32>
    %cst_7 = arith.constant 3.906250e-03 : f32
    %36 = vector.broadcast %cst_7 : f32 to vector<8x1xf32>
    %37 = arith.mulf %32, %36 : vector<8x1xf32>
    %cst_8 = arith.constant 3.906250e-03 : f32
    %38 = vector.broadcast %cst_8 : f32 to vector<8x1xf32>
    %39 = arith.mulf %35, %38 : vector<8x1xf32>
    %40 = arith.mulf %37, %37 : vector<8x1xf32>
    %41 = arith.subf %39, %40 : vector<8x1xf32>
    %cst_9 = arith.constant 0.000000e+00 : f32
    %42 = vector.broadcast %cst_9 : f32 to vector<8x1xf32>
    %43 = arith.maximumf %41, %42 : vector<8x1xf32>
    %44 = vector.broadcast %37 : vector<8x1xf32> to vector<8x256xf32>
    %45 = arith.subf %29, %44 : vector<8x256xf32>
    %cst_10 = arith.constant 9.99999974E-6 : f32
    %46 = vector.broadcast %cst_10 : f32 to vector<8x1xf32>
    %47 = arith.addf %43, %46 : vector<8x1xf32>
    %48 = math.rsqrt %47 : vector<8x1xf32>
    %49 = vector.broadcast %48 : vector<8x1xf32> to vector<8x256xf32>
    %50 = arith.mulf %45, %49 : vector<8x256xf32>
    %51 = vector.extract_strided_slice %50 {offsets = [0, 222], sizes = [8, 34], strides = [1, 1]} : vector<8x256xf32> to vector<8x34xf32>
    %52 = vector.extract_strided_slice %50 {offsets = [0, 0], sizes = [8, 222], strides = [1, 1]} : vector<8x256xf32> to vector<8x222xf32>
    %53 = tpu.concatenate %51, %52 in 1 : vector<8x34xf32>, vector<8x222xf32> -> vector<8x256xf32>
    %c0_11 = arith.constant 0 : index
    %c0_12 = arith.constant 0 : index
    %54 = vector.load %arg4[%c0_11, %c0_12] : memref<9x256xf32, #tpu.memory_space<vmem>>, vector<1x256xf32>
    %55 = vector.broadcast %54 : vector<1x256xf32> to vector<8x256xf32>
    %56 = arith.mulf %53, %55 : vector<8x256xf32>
    %57 = arith.truncf %56 : vector<8x256xf32> to vector<8x256xbf16>
    %c0_13 = arith.constant 0 : index
    %c0_14 = arith.constant 0 : index
    %58 = vector.load %arg6[%c0_13, %c0_14] : memref<72x256xbf16, #tpu.memory_space<vmem>>, vector<8x256xbf16>
    tpu.vector_store %arg6[%c0_13, %c0_14], %57 {strides = array<i32>} : memref<72x256xbf16, #tpu.memory_space<vmem>>, vector<8x256xbf16>,
    %59 = vector.extract_strided_slice %50 {offsets = [0, 224], sizes = [8, 32], strides = [1, 1]} : vector<8x256xf32> to vector<8x32xf32>
    %60 = vector.extract_strided_slice %50 {offsets = [0, 0], sizes = [8, 224], strides = [1, 1]} : vector<8x256xf32> to vector<8x224xf32>
    %61 = tpu.concatenate %59, %60 in 1 : vector<8x32xf32>, vector<8x224xf32> -> vector<8x256xf32>
    %c1 = arith.constant 1 : index
    %c0_15 = arith.constant 0 : index
    %62 = vector.load %arg4[%c1, %c0_15] : memref<9x256xf32, #tpu.memory_space<vmem>>, vector<1x256xf32>
    %63 = vector.broadcast %62 : vector<1x256xf32> to vector<8x256xf32>
    %64 = arith.mulf %61, %63 : vector<8x256xf32>
    %65 = arith.truncf %64 : vector<8x256xf32> to vector<8x256xbf16>
    %c8 = arith.constant 8 : index
    %c0_16 = arith.constant 0 : index
    %66 = vector.load %arg6[%c8, %c0_16] : memref<72x256xbf16, #tpu.memory_space<vmem>>, vector<8x256xbf16>
    tpu.vector_store %arg6[%c8, %c0_16], %65 {strides = array<i32>} : memref<72x256xbf16, #tpu.memory_space<vmem>>, vector<8x256xbf16>,
    %67 = vector.extract_strided_slice %50 {offsets = [0, 226], sizes = [8, 30], strides = [1, 1]} : vector<8x256xf32> to vector<8x30xf32>
    %68 = vector.extract_strided_slice %50 {offsets = [0, 0], sizes = [8, 226], strides = [1, 1]} : vector<8x256xf32> to vector<8x226xf32>
    %69 = tpu.concatenate %67, %68 in 1 : vector<8x30xf32>, vector<8x226xf32> -> vector<8x256xf32>
    %c2 = arith.constant 2 : index
    %c0_17 = arith.constant 0 : index
    %70 = vector.load %arg4[%c2, %c0_17] : memref<9x256xf32, #tpu.memory_space<vmem>>, vector<1x256xf32>
    %71 = vector.broadcast %70 : vector<1x256xf32> to vector<8x256xf32>
    %72 = arith.mulf %69, %71 : vector<8x256xf32>
    %73 = arith.truncf %72 : vector<8x256xf32> to vector<8x256xbf16>
    %c16 = arith.constant 16 : index
    %c0_18 = arith.constant 0 : index
    %74 = vector.load %arg6[%c16, %c0_18] : memref<72x256xbf16, #tpu.memory_space<vmem>>, vector<8x256xbf16>
    tpu.vector_store %arg6[%c16, %c0_18], %73 {strides = array<i32>} : memref<72x256xbf16, #tpu.memory_space<vmem>>, vector<8x256xbf16>,
    %75 = vector.extract_strided_slice %50 {offsets = [0, 254], sizes = [8, 2], strides = [1, 1]} : vector<8x256xf32> to vector<8x2xf32>
    %76 = vector.extract_strided_slice %50 {offsets = [0, 0], sizes = [8, 254], strides = [1, 1]} : vector<8x256xf32> to vector<8x254xf32>
    %77 = tpu.concatenate %75, %76 in 1 : vector<8x2xf32>, vector<8x254xf32> -> vector<8x256xf32>
    %c3 = arith.constant 3 : index
    %c0_19 = arith.constant 0 : index
    %78 = vector.load %arg4[%c3, %c0_19] : memref<9x256xf32, #tpu.memory_space<vmem>>, vector<1x256xf32>
    %79 = vector.broadcast %78 : vector<1x256xf32> to vector<8x256xf32>
    %80 = arith.mulf %77, %79 : vector<8x256xf32>
    %81 = arith.truncf %80 : vector<8x256xf32> to vector<8x256xbf16>
    %c24 = arith.constant 24 : index
    %c0_20 = arith.constant 0 : index
    %82 = vector.load %arg6[%c24, %c0_20] : memref<72x256xbf16, #tpu.memory_space<vmem>>, vector<8x256xbf16>
    tpu.vector_store %arg6[%c24, %c0_20], %81 {strides = array<i32>} : memref<72x256xbf16, #tpu.memory_space<vmem>>, vector<8x256xbf16>,
    %83 = arith.truncf %50 : vector<8x256xf32> to vector<8x256xbf16>
    %c32 = arith.constant 32 : index
    %c0_21 = arith.constant 0 : index
    %84 = vector.load %arg6[%c32, %c0_21] : memref<72x256xbf16, #tpu.memory_space<vmem>>, vector<8x256xbf16>
    tpu.vector_store %arg6[%c32, %c0_21], %83 {strides = array<i32>} : memref<72x256xbf16, #tpu.memory_space<vmem>>, vector<8x256xbf16>,
    %85 = vector.extract_strided_slice %50 {offsets = [0, 2], sizes = [8, 254], strides = [1, 1]} : vector<8x256xf32> to vector<8x254xf32>
    %86 = vector.extract_strided_slice %50 {offsets = [0, 0], sizes = [8, 2], strides = [1, 1]} : vector<8x256xf32> to vector<8x2xf32>
    %87 = tpu.concatenate %85, %86 in 1 : vector<8x254xf32>, vector<8x2xf32> -> vector<8x256xf32>
    %c5 = arith.constant 5 : index
    %c0_22 = arith.constant 0 : index
    %88 = vector.load %arg4[%c5, %c0_22] : memref<9x256xf32, #tpu.memory_space<vmem>>, vector<1x256xf32>
    %89 = vector.broadcast %88 : vector<1x256xf32> to vector<8x256xf32>
    %90 = arith.mulf %87, %89 : vector<8x256xf32>
    %91 = arith.truncf %90 : vector<8x256xf32> to vector<8x256xbf16>
    %c40 = arith.constant 40 : index
    %c0_23 = arith.constant 0 : index
    %92 = vector.load %arg6[%c40, %c0_23] : memref<72x256xbf16, #tpu.memory_space<vmem>>, vector<8x256xbf16>
    tpu.vector_store %arg6[%c40, %c0_23], %91 {strides = array<i32>} : memref<72x256xbf16, #tpu.memory_space<vmem>>, vector<8x256xbf16>,
    %93 = vector.extract_strided_slice %50 {offsets = [0, 30], sizes = [8, 226], strides = [1, 1]} : vector<8x256xf32> to vector<8x226xf32>
    %94 = vector.extract_strided_slice %50 {offsets = [0, 0], sizes = [8, 30], strides = [1, 1]} : vector<8x256xf32> to vector<8x30xf32>
    %95 = tpu.concatenate %93, %94 in 1 : vector<8x226xf32>, vector<8x30xf32> -> vector<8x256xf32>
    %c6 = arith.constant 6 : index
    %c0_24 = arith.constant 0 : index
    %96 = vector.load %arg4[%c6, %c0_24] : memref<9x256xf32, #tpu.memory_space<vmem>>, vector<1x256xf32>
    %97 = vector.broadcast %96 : vector<1x256xf32> to vector<8x256xf32>
    %98 = arith.mulf %95, %97 : vector<8x256xf32>
    %99 = arith.truncf %98 : vector<8x256xf32> to vector<8x256xbf16>
    %c48 = arith.constant 48 : index
    %c0_25 = arith.constant 0 : index
    %100 = vector.load %arg6[%c48, %c0_25] : memref<72x256xbf16, #tpu.memory_space<vmem>>, vector<8x256xbf16>
    tpu.vector_store %arg6[%c48, %c0_25], %99 {strides = array<i32>} : memref<72x256xbf16, #tpu.memory_space<vmem>>, vector<8x256xbf16>,
    %101 = vector.extract_strided_slice %50 {offsets = [0, 32], sizes = [8, 224], strides = [1, 1]} : vector<8x256xf32> to vector<8x224xf32>
    %102 = vector.extract_strided_slice %50 {offsets = [0, 0], sizes = [8, 32], strides = [1, 1]} : vector<8x256xf32> to vector<8x32xf32>
    %103 = tpu.concatenate %101, %102 in 1 : vector<8x224xf32>, vector<8x32xf32> -> vector<8x256xf32>
    %c7 = arith.constant 7 : index
    %c0_26 = arith.constant 0 : index
    %104 = vector.load %arg4[%c7, %c0_26] : memref<9x256xf32, #tpu.memory_space<vmem>>, vector<1x256xf32>
    %105 = vector.broadcast %104 : vector<1x256xf32> to vector<8x256xf32>
    %106 = arith.mulf %103, %105 : vector<8x256xf32>
    %107 = arith.truncf %106 : vector<8x256xf32> to vector<8x256xbf16>
    %c56 = arith.constant 56 : index
    %c0_27 = arith.constant 0 : index
    %108 = vector.load %arg6[%c56, %c0_27] : memref<72x256xbf16, #tpu.memory_space<vmem>>, vector<8x256xbf16>
    tpu.vector_store %arg6[%c56, %c0_27], %107 {strides = array<i32>} : memref<72x256xbf16, #tpu.memory_space<vmem>>, vector<8x256xbf16>,
    %109 = vector.extract_strided_slice %50 {offsets = [0, 34], sizes = [8, 222], strides = [1, 1]} : vector<8x256xf32> to vector<8x222xf32>
    %110 = vector.extract_strided_slice %50 {offsets = [0, 0], sizes = [8, 34], strides = [1, 1]} : vector<8x256xf32> to vector<8x34xf32>
    %111 = tpu.concatenate %109, %110 in 1 : vector<8x222xf32>, vector<8x34xf32> -> vector<8x256xf32>
    %c8_28 = arith.constant 8 : index
    %c0_29 = arith.constant 0 : index
    %112 = vector.load %arg4[%c8_28, %c0_29] : memref<9x256xf32, #tpu.memory_space<vmem>>, vector<1x256xf32>
    %113 = vector.broadcast %112 : vector<1x256xf32> to vector<8x256xf32>
    %114 = arith.mulf %111, %113 : vector<8x256xf32>
    %115 = arith.truncf %114 : vector<8x256xf32> to vector<8x256xbf16>
    %c64 = arith.constant 64 : index
    %c0_30 = arith.constant 0 : index
    %116 = vector.load %arg6[%c64, %c0_30] : memref<72x256xbf16, #tpu.memory_space<vmem>>, vector<8x256xbf16>
    tpu.vector_store %arg6[%c64, %c0_30], %115 {strides = array<i32>} : memref<72x256xbf16, #tpu.memory_space<vmem>>, vector<8x256xbf16>,
    %c0_31 = arith.constant 0 : index
    %c0_32 = arith.constant 0 : index
    %117 = vector.load %arg3[%c0_31, %c0_32] : memref<8x72xbf16, #tpu.memory_space<vmem>>, vector<8x72xbf16>
    %c0_33 = arith.constant 0 : index
    %c0_34 = arith.constant 0 : index
    %118 = vector.load %arg6[%c0_33, %c0_34] : memref<72x256xbf16, #tpu.memory_space<vmem>>, vector<72x256xbf16>
    %cst_35 = arith.constant dense<0.000000e+00> : vector<8x256xf32>
    %119 = tpu.matmul %117, %118, %cst_35 {dimension_numbers = #tpu.dot_dimension_numbers<[1], [0], [0], [1], [0, 0, 1, 1], [], []>} : vector<8x72xbf16>, vector<72x256xbf16>, vector<8x256xf32> -> vector<8x256xf32>
    %c0_36 = arith.constant 0 : index
    %c0_37 = arith.constant 0 : index
    %120 = vector.load %arg7[%c0_36, %c0_37] : memref<8x256xf32, #tpu.memory_space<vmem>>, vector<8x256xf32>
    %121 = math.tanh %119 : vector<8x256xf32>
    %122 = arith.addf %120, %121 : vector<8x256xf32>
    %123 = math.tanh %122 : vector<8x256xf32>
    %c0_38 = arith.constant 0 : index
    %c0_39 = arith.constant 0 : index
    %c0_40 = arith.constant 0 : index
    %124 = vector.load %arg5[%c0_38, %c0_39, %c0_40] : memref<1x8x256xf32, #tpu.memory_space<vmem>>, vector<1x8x256xf32>
    %125 = vector.shape_cast %124 : vector<1x8x256xf32> to vector<8x256xf32>
    %126 = vector.shape_cast %123 : vector<8x256xf32> to vector<1x8x256xf32>
    tpu.vector_store %arg5[%c0_38, %c0_39, %c0_40], %126 {strides = array<i32>} : memref<1x8x256xf32, #tpu.memory_space<vmem>>, vector<1x8x256xf32>,
    return
  }
  func.func @transform_0(%arg0: i32) -> (i32, i32, i32) {
    %c0_i32 = arith.constant 0 : i32
    %c0_i32_0 = arith.constant 0 : i32
    %c0_i32_1 = arith.constant 0 : i32
    return %arg0, %c0_i32, %c0_i32_0 : i32, i32, i32
  }
  func.func @transform_1(%arg0: i32) -> (i32, i32) {
    %c0_i32 = arith.constant 0 : i32
    %c0_i32_0 = arith.constant 0 : i32
    %c0_i32_1 = arith.constant 0 : i32
    return %c0_i32, %c0_i32_0 : i32, i32
  }
  func.func @transform_2(%arg0: i32) -> (i32, i32) {
    %c0_i32 = arith.constant 0 : i32
    %c0_i32_0 = arith.constant 0 : i32
    %c0_i32_1 = arith.constant 0 : i32
    return %c0_i32, %c0_i32_0 : i32, i32
  }
  func.func @transform_3(%arg0: i32) -> (i32, i32) {
    %c0_i32 = arith.constant 0 : i32
    %c0_i32_0 = arith.constant 0 : i32
    %c0_i32_1 = arith.constant 0 : i32
    return %c0_i32, %c0_i32_0 : i32, i32
  }
  func.func @transform_4(%arg0: i32) -> (i32, i32, i32) {
    %c0_i32 = arith.constant 0 : i32
    %c0_i32_0 = arith.constant 0 : i32
    %c0_i32_1 = arith.constant 0 : i32
    return %arg0, %c0_i32, %c0_i32_0 : i32, i32, i32
  }
}

</mosaic_0001>

<bundles_post_ra>
// kernel: tpu_custom_call.1
= control target key start
LH: loop header
LB: loop body
LE: loop exit
PB: predicated region body
PF: predicated region fallthrough
CT: control target
= control target key end

     0   :  { %9 = vsyncpa [#allocation5], 0  ;;  %s1390_s0 = inlined_call_operand.hbm [shape: f32[2,4,256], index: 0, kind: input, shape index: {}]   ;;  %s1391_s1 = inlined_call_operand.vmem [shape: f32[8,4], index: 1, kind: input, shape index: {}]   ;;  %s1392_s2 = inlined_call_operand.vmem [shape: bf16[8,72], index: 2, kind: input, shape index: {}]   ;;  %s1393_s3 = inlined_call_operand.hbm [shape: f32[9,256], index: 3, kind: input, shape index: {}]   ;;  %s1394_s4 = inlined_call_operand.hbm [shape: f32[2,8,256], index: 4, kind: output, shape index: {}]  }
   0x1   :  { %11 = vsyncpa [#allocation5 + $0x1], 0 }
   0x2   :  { %12 = vsyncpa [#allocation8], 0 }
   0x3   :  { %13 = vsyncpa [#allocation6], 0 }
   0x4   :  { %15 = vsyncpa [#allocation6 + $0x1], 0  ;;  %s1161_s15 = smov 0   ;;  %s1163_s16 = smov 0  }
   0x5   :  { %s1165_s17 = smov 0   ;;  %s1167_s18 = smov 0  }
   0x6 LB: > { %s1182_s19 = sadd.s32 4294967295, %s1117_s18   ;;  %s851_s20 = sadd.s32 4294967294, %s1117_s18   ;;  %s1117_s18 = sphi %s1167_s18, %s1416_s18   ;;  %s1113_s17 = sphi %s1165_s17, %s1415_s17   ;;  %s1109_s16 = sphi %s1163_s16, %s1414_s16   ;;  %s1105_s15 = sphi %s1161_s15, %s1413_s15  }
   0x7   : > { %p41_p0 = scmp.ne.s32.totalorder %s1109_s16, %s1105_s15  ;;  %p1395_p1 = scmp.eq.s32.totalorder %s1182_s19, 0 }
   0x8   : > { %p134_p3 = scmp.eq.s32.totalorder %s851_s20, 1  ;;  %p852_p5 = scmp.ge.s32.totalorder %s1117_s18, 1 }
   0x9   : > { %p1191_p4 = por %p1395_p1, %p41_p0  ;;  %p141_p7 = scmp.lt.s32.totalorder %s1117_s18, 3 }
   0xa   : > { %p1196_p6 = por %p134_p3, %p41_p0  ;;  %s1119_s24 = smov [#allocation7]  }
   0xb   : > { %s1399_s21 = scalar_select %p1191_p4, 1, 0 }
   0xc   : > { %s1400_s22 = scalar_select %p1196_p6, 1, 0 }
   0xd   : > { %p1201_p8 = pnand %p852_p5, %p141_p7  ;;  %s159_s25 = sshll.u32 %s1119_s24, 4  ;;  %s160_s25 = int_to_ptr.vmem [resolvable:$true] %s159_s25 }
   0xe   : > { %s1215_s27 = sadd.s32 1, %s1117_s18   ;;  %s28_s28 = sadd.s32 1, %s1113_s17 }
   0xf   : > { %s1401_s23 = scalar_select %p1201_p8, 1, 0 }
  0x10   : > { %p917_p9 = pneg %p1201_p8  ;;  %s25_s29 = ssub.s32 %s1117_s18, %s1215_s27 }
  0x11   : > { %s1006_s30 = scalar_lea.vmem %s160_s25, 512  ;;  %p1014_p5 = scmp.lt.s32.totalorder %s160_s25, %s160_s25 }
  0x12   : > { %p1210_p11 = pnand %p917_p9, %p1395_p1  ;;  %p1007_p13 = scmp.ne.s32.totalorder %s160_s25, %s1006_s30 }
  0x13   : > { %p1015_p7 = scmp.lt.s32.totalorder %s1006_s30, %s1006_s30 }
  0x14   : > { %p997_p12 = pneg %p1210_p11 }
  0x15   : > { %p1016_p10 = por %p1015_p7, %p1014_p5 }
  0x16   : > { %p1009_p0 = pnand %p1007_p13, %p997_p12 }
  0x18   : > { %p1010_p3 = pneg %p1009_p0 }
  0x1a   : > { %p1017_p2 = pnand %p1016_p10, %p1010_p3 }
  0x1c   : > { %1020 = shalt.err (!%p1017_p2)
}
  0x1d   : > { %s1120_s5 = smov 256   ;;  %s1121_s6 = smov 16  }
  0x1e   : > { %920 = dma.hbm_to_vmem [thread:$0]  (!%p1210_p11), %s1393_s3, 512, %s160_s25, [#allocation8], %s1120_s5, %s1120_s5, %s1121_s6  }
  0x1f   : > { %p26_p9 = scmp.eq.s32.totalorder %s25_s29, 0  ;;  %p35_p12 = scmp.ne.s32.totalorder %s1113_s17, %s1109_s16 }
  0x20   : > { %p36_p10 = scmp.eq.s32.totalorder %s1117_s18, 0  ;;  %p930_p2 = scmp.lt.s32.totalorder %s1117_s18, 2 }
  0x21   : > { %s1232_s9 = scalar_select %p26_p9, %s1113_s17, %s28_s28  }
  0x22   : > { %p37_p13 = por %p36_p10, %p35_p12  ;;  %p1403_p0 = scmp.eq.s32.totalorder %s1182_s19, 1 }
  0x23   : > { %s173_s11 = sand.u32 1, %s1113_s17   ;;  %s888_s12 = sshll.u32 %s1117_s18, 7 }
  0x24   : > { %p1236_p3 = por %p1403_p0, %p35_p12  ;;  %s855_s13 = sshll.u32 %s173_s11, 3 }
  0x25   : > { %s1245_s24 = scalar_lea.hbm %s1390_s0, %s888_s12  ;;  %s177_s25 = scalar_lea.vmem [#allocation4], %s855_s13 }
  0x26   : > { %s1404_s10 = scalar_select %p1236_p3, 1, 0 }
  0x27   : > { %s185_s26 = sshll.u32 %s177_s25, 4  ;;  %p1247_p11 = pnand %p930_p2, %p37_p13  ;;  %s186_s26 = int_to_ptr.vmem [resolvable:$true] %s185_s26 }
  0x28   : > { %s174_s29 = scalar_lea.sflag [#allocation5], %s173_s11  ;;  %s1021_s30 = scalar_lea.hbm %s1245_s24, 128 }
  0x29   : > { %p1022_p5 = scmp.ne.s32.totalorder %s1245_s24, %s1021_s30  ;;  %p1023_p7 = pneg %p1247_p11 }
  0x2a   : > { %s1026_s7 = scalar_lea.hbm %s1390_s0, 256  ;;  %p1027_p10 = scmp.lt.s32.totalorder %s1245_s24, %s1390_s0 }
  0x2b   : > { %p1024_p9 = pnand %p1023_p7, %p1022_p5  ;;  %p1028_p2 = scmp.lt.s32.totalorder %s1026_s7, %s1021_s30 }
  0x2d   : > { %p1025_p12 = pneg %p1024_p9  ;;  %p1029_p13 = por %p1028_p2, %p1027_p10 }
  0x2f   : > { %p1030_p0 = pnand %p1029_p13, %p1025_p12 }
  0x31   : > { %1033 = shalt.err (!%p1030_p0)
}
  0x32   : > { %s1034_s13 = scalar_lea.vmem %s186_s26, 128  ;;  %s1122_s11 = smov [#allocation4]  }
  0x33   : > { %p1035_p1 = scmp.ne.s32.totalorder %s186_s26, %s1034_s13  ;;  %s1039_s14 = sshll.u32 %s1122_s11, 4  ;;  %s1040_s14 = int_to_ptr.vmem [resolvable:$false] %s1039_s14 }
  0x34   : > { %s1041_s20 = scalar_lea.vmem %s1040_s14, 256  ;;  %p1042_p5 = scmp.lt.s32.totalorder %s186_s26, %s1040_s14 }
  0x35   : > { %p1037_p6 = pnand %p1035_p1, %p1023_p7  ;;  %p1043_p9 = scmp.lt.s32.totalorder %s1041_s20, %s1034_s13 }
  0x37   : > { %p1038_p3 = pneg %p1037_p6  ;;  %p1044_p4 = por %p1043_p9, %p1042_p5 }
  0x39   : > { %p1045_p8 = pnand %p1044_p4, %p1038_p3 }
  0x3b   : > { %1048 = shalt.err (!%p1045_p8)
}
  0x3c   : > { %924 = dma.hbm_to_vmem [thread:$0]  (!%p1247_p11), %s1245_s24, 128, %s186_s26, %s174_s29  }
  0x3d   : > { %p1406_p12 = scmp.ne.s32.totalorder %s1401_s23, 0 }
  0x3e   : > { %s1268_s25 = sand.u32 (!%p1406_p12), 1, %s1109_s16   ;;  %p1407_p1 = scmp.ne.s32.totalorder (!%p1406_p12), %s1399_s21, 0 }
  0x3f   : > { %194 = sbr.rel (%p1406_p12) target bundleno = 767 (0x2ff), region = 36  ;;  %s859_s30 = sshll.u32 (!%p1406_p12), %s1268_s25, 3 }
  0x40   : > { %s197_s5 = scalar_lea.sflag (!%p1406_p12), [#allocation5], %s1268_s25  ;;  %s200_s6 = scalar_lea.vmem (!%p1406_p12), [#allocation4], %s859_s30 }
  0x44   : > { %1092 = dma.done.wait (%p1407_p1), %s197_s5, 128  }
  0x45   : > { %1094 = vsyncadd (%p1407_p1), %s197_s5, 4294967168  ;;  %p1408_p4 = scmp.eq.s32.totalorder %s1182_s19, 0 }
  0x47   : > { %1096 = dma.done.wait (%p1408_p4), [#allocation8], 512   ;;  %p1409_p6 = pmov %p1408_p4 }
  0x48   : > { %v1123_v0 = vmov 0   ;;  %v1124_v1 = vmov 2   ;;  %v230_v2 = vld [vmem:[%s1391_s1] sm:$0xff]  ;;  %v1125_v3 = vmov 1   ;;  %v1126_v4 = vmov 3   ;;  %s1127_s21 = smov 94  }
  0x49   : > { %1098 = vsyncadd (%p1409_p6), [#allocation8], 4294966784  ;;  %980 = vset.pattern.permute.xlu0 %v1123_v0  ;;  %982 = vset.pattern.permute.xlu1 %v1124_v1  ;;  %v250_v5 = vlaneseq  ;;  %v248_v11 = vld [vmem:[%s200_s6] sm:$0xff]  ;;  %s1128_s26 = smov 98   ;;  %s1129_s28 = smov 96   ;;  %vm609_vm0 = vcmask 769024  }
  0x4a   : > { %737 = vmatprep.mubr.bf16.mxu0 %v1123_v0  ;;  %233 = vperm.xlu0 %980, %v230_v2   ;;  %s1130_s29 = smov 126   ;;  %s1131_s7 = smov 30   ;;  %vm698_vm1 = vcmask 1043456   ;;  %vm541_vm2 = vcmask 801792   ;;  %vm575_vm3 = vcmask 785408   ;;  %vm507_vm4 = vcmask 1031168  }
  0x4b   : > { %241 = vperm.xlu1 %982, %v230_v2   ;;  %v251_v6 = vshrl.u32 %v250_v5, 7  ;;  %s1132_s8 = smov 2   ;;  %s1133_s12 = smov 34   ;;  %vm431_vm5 = vcmask 244736   ;;  %vm465_vm6 = vcmask 15360   ;;  %vm364_vm7 = vcmask 277504  }
  0x4c   : > { %s1134_s13 = smov 32   ;;  %vm397_vm8 = vcmask 261120   ;;  %vm694_vm9 = vcmask 588800   ;;  %s861_s20 = sshll.u32 %s1268_s25, 4 }
  0x4d   : > { %v1283_v7 = vsub.s32 0, %v251_v6  ;;  %v256_v8 = vsub.s32 4, %v251_v6  ;;  %v1285_v9 = vsub.s32 1, %v251_v6  ;;  %v276_v10 = vsub.s32 5, %v251_v6  ;;  %s898_s30 = sshll.u32 %s1182_s19, 8  ;;  %s228_s5 = scalar_lea.vmem [#allocation9], %s861_s20 }
  0x4e   : > { %981 = vset.pattern.permute.xlu0 %v1125_v3  ;;  %v294_v12 = vsub.s32 2, %v251_v6  ;;  %v298_v13 = vsub.s32 6, %v251_v6  ;;  %v316_v14 = vsub.s32 3, %v251_v6  ;;  %v320_v15 = vsub.s32 7, %v251_v6  ;;  %s771_s6 = sshll.u32 %s228_s5, 4  ;;  %p1410_p3 = scmp.ne.s32.totalorder %s1404_s10, 0  ;;  %s772_s6 = int_to_ptr.vmem [resolvable:$true] %s771_s6 }
  0x4f   : > { %983 = vset.pattern.permute.xlu1 %v1126_v4  ;;  %237 = vperm.xlu0 %981, %v230_v2   ;;  %v253_v16 = vrot.slane %v248_v11, %v1283_v7  ;;  %v257_v17 = vrot.slane %v248_v11, %v256_v8  ;;  %v273_v18 = vrot.slane %v248_v11, %v1285_v9  ;;  %v616_v3 = vld [vmem:[#allocation7 + $0x10] ss:$8 sm:$0x3] }
  0x50   : > { %245 = vperm.xlu1 %983, %v230_v2   ;;  %v277_v19 = vrot.slane %v248_v11, %v276_v10  ;;  %v295_v20 = vrot.slane %v248_v11, %v294_v12  ;;  %v299_v21 = vrot.slane %v248_v11, %v298_v13  ;;  %v317_v24 = vrot.slane %v248_v11, %v316_v14  ;;  %v548_v13 = vld [vmem:[#allocation7 + $0x6] ss:$8 sm:$0x3] }
  0x51   : > { %v321_v25 = vrot.slane %v248_v11, %v320_v15  ;;  %v263_v26 = vrot.slane %v253_v16, %v1283_v7  ;;  %v267_v27 = vrot.slane %v257_v17, %v1283_v7  ;;  %v283_v28 = vrot.slane %v273_v18, %v1285_v9  ;;  %v582_v15 = vld [vmem:[#allocation7 + $0x7] ss:$8 sm:$0x3] }
  0x52   : > { %v287_v29 = vrot.slane %v277_v19, %v1285_v9  ;;  %v305_v30 = vrot.slane %v295_v20, %v294_v12  ;;  %v309_v31 = vrot.slane %v299_v21, %v294_v12  ;;  %v327_v32 = vrot.slane %v317_v24, %v316_v14 }
  0x53   : > { %984 = vset.pattern.permute.xlu0 %v1126_v4  ;;  %v331_v33 = vrot.slane %v321_v25, %v316_v14  ;;  %v621_v4 = vrot.slane %v616_v3, %v1283_v7  ;;  %v625_v5 = vrot.slane %v616_v3, %v1285_v9  ;;  %v553_v20 = vrot.slane %v548_v13, %v1283_v7  ;;  %v514_v25 = vld [vmem:[#allocation7 + $0x5] ss:$8 sm:$0x3] }
  0x54   : > { %v557_v21 = vrot.slane %v548_v13, %v1285_v9  ;;  %v591_v24 = vrot.slane %v582_v15, %v1285_v9 }
  0xc5   : > { %v234_v22 = vpop.permute.xlu0 %233 }
  0xc6   : > { %v242_v23 = vpop.permute.xlu1 %241  ;;  %v268_v36 = vmul.f32 %v263_v26, %v234_v22  ;;  %v269_v37 = vmul.f32 %v267_v27, %v234_v22 }
  0xc7   : > { %v310_v40 = vmul.f32 %v305_v30, %v242_v23  ;;  %v311_v41 = vmul.f32 %v309_v31, %v242_v23  ;;  %v587_v23 = vrot.slane %v582_v15, %v1283_v7 }
  0xca   : > { %v238_v34 = vpop.permute.xlu0 %237 }
  0xcb   : > { %v246_v35 = vpop.permute.xlu1 %245  ;;  %v288_v38 = vmul.f32 %v283_v28, %v238_v34  ;;  %v289_v39 = vmul.f32 %v287_v29, %v238_v34 }
  0xcc   : > { %v332_v44 = vmul.f32 %v327_v32, %v246_v35  ;;  %v333_v45 = vmul.f32 %v331_v33, %v246_v35  ;;  %v519_v32 = vrot.slane %v514_v25, %v1283_v7  ;;  %v523_v33 = vrot.slane %v514_v25, %v1285_v9 }
  0xcd   : > { %v290_v42 = vadd.f32 %v288_v38, %v268_v36  ;;  %v291_v43 = vadd.f32 %v289_v39, %v269_v37 }
  0xcf   : > { %v312_v46 = vadd.f32 %v310_v40, %v290_v42  ;;  %v313_v47 = vadd.f32 %v311_v41, %v291_v43 }
  0xd1   : > { %v1293_v48 = vadd.f32 %v332_v44, %v312_v46  ;;  %v1295_v49 = vadd.f32 %v333_v45, %v313_v47  ;;  %v437_v46 = vld [vmem:[#allocation7 + $0x2] ss:$8 sm:$0x3]  ;;  %v471_v47 = vld [vmem:[#allocation7 + $0x3] ss:$8 sm:$0x3] }
  0xd3   : > { %v338_v50 = vadd.f32 %v1295_v49, %v1293_v48  ;;  %v341_v51 = vmul.f32 %v1293_v48, %v1293_v48  ;;  %v342_v52 = vmul.f32 %v1295_v49, %v1295_v49 }
  0xd5   : > { %339 = vadd.xlane.f32.xlu1 %v338_v50  ;;  %v343_v53 = vadd.f32 %v342_v52, %v341_v51 }
  0xd7   : > { %344 = vadd.xlane.f32.xlu0 %v343_v53 }
 0x15e   : > { %v340_v54 = vpop.xlane.xlu1 %339 }
 0x15f   : > { %v346_v55 = vmul.f32 0.00390625, %v340_v54  ;;  %v442_v54 = vrot.slane %v437_v46, %v1283_v7 }
 0x160   : > { %v345_v56 = vpop.xlane.xlu0 %344 }
 0x161   : > { %v347_v57 = vmul.f32 0.00390625, %v345_v56  ;;  %v348_v58 = vmul.f32 %v346_v55, %v346_v55  ;;  %v351_v62 = vsub.f32 %v1293_v48, %v346_v55  ;;  %v352_v63 = vsub.f32 %v1295_v49, %v346_v55 }
 0x162   : > { %v446_v55 = vrot.slane %v437_v46, %v1285_v9  ;;  %v476_v56 = vrot.slane %v471_v47, %v1283_v7 }
 0x163   : > { %v349_v59 = vsub.f32 %v347_v57, %v348_v58  ;;  %v480_v57 = vrot.slane %v471_v47, %v1285_v9 }
 0x165   : > { %v350_v60 = vmax.f32 %v349_v59, 0.0 }
 0x167   : > { %v353_v61 = vadd.f32 1e-05, %v350_v60 }
 0x169   : > { %985 = vrsqrt.f32 %v353_v61 }
 0x176   : > { %v986_v0 = vpop.eup %985 }
 0x177   : > { %v1305_v1 = vmul.f32 %v986_v0, %v351_v62  ;;  %v1307_v2 = vmul.f32 %v986_v0, %v352_v63 }
 0x179   : > { %607 = vrot.lane.b32.xlu1 %v1307_v2, %s1127_s21  ;;  %605 = vrot.lane.b32.xlu0 %v1305_v1, %s1127_s21  ;;  %s1353_s21 = scalar_lea.hbm %s1394_s4, %s898_s30 }
 0x17d   : > { %537 = vrot.lane.b32.xlu1 %v1305_v1, %s1128_s26  ;;  %539 = vrot.lane.b32.xlu0 %v1307_v2, %s1128_s26  ;;  %s757_s26 = scalar_lea.sflag [#allocation6], %s1268_s25 }
 0x181   : > { %571 = vrot.lane.b32.xlu1 %v1305_v1, %s1129_s28  ;;  %573 = vrot.lane.b32.xlu0 %v1307_v2, %s1129_s28  ;;  %s1049_s28 = scalar_lea.vmem %s772_s6, 256 }
 0x182   : > { %p1050_p8 = scmp.ne.s32.totalorder %s772_s6, %s1049_s28 }
 0x184   : > { %p1051_p11 = pnand %p1050_p8, %p1410_p3 }
 0x185   : > { %503 = vrot.lane.b32.xlu1 %v1305_v1, %s1130_s29  ;;  %505 = vrot.lane.b32.xlu0 %v1307_v2, %s1130_s29  ;;  %s1135_s29 = smov [#allocation9]  }
 0x186   : > { %p1052_p7 = pneg %p1051_p11  ;;  %s1053_s19 = sshll.u32 %s1135_s29, 4  ;;  %s1054_s19 = int_to_ptr.vmem [resolvable:$false] %s1053_s19 }
 0x187   : > { %p1056_p10 = scmp.lt.s32.totalorder %s772_s6, %s1054_s19 }
 0x189   : > { %426 = vrot.lane.b32.xlu1 %v1307_v2, %s1131_s7  ;;  %429 = vrot.lane.b32.xlu0 %v1305_v1, %s1131_s7  ;;  %s1055_s7 = scalar_lea.vmem %s1054_s19, 512 }
 0x18a   : > { %p1057_p2 = scmp.lt.s32.totalorder %s1055_s7, %s1049_s28 }
 0x18c   : > { %p1058_p13 = por %p1057_p2, %p1056_p10 }
 0x18d   : > { %460 = vrot.lane.b32.xlu1 %v1307_v2, %s1132_s8  ;;  %463 = vrot.lane.b32.xlu0 %v1305_v1, %s1132_s8 }
 0x18e   : > { %p1059_p0 = pnand %p1058_p13, %p1052_p7 }
 0x191   : > { %358 = vrot.lane.b32.xlu1 %v1307_v2, %s1133_s12  ;;  %362 = vrot.lane.b32.xlu0 %v1305_v1, %s1133_s12 }
 0x195   : > { %392 = vrot.lane.b32.xlu1 %v1307_v2, %s1134_s13  ;;  %395 = vrot.lane.b32.xlu0 %v1305_v1, %s1134_s13 }
 0x1eb   : > { %v608_v6 = vpop.permute.xlu1 %607  ;;  %v606_v8 = vpop.permute.xlu0 %605 }
 0x1ec   : > { %v610_v10 = vsel %vm609_vm0, %v606_v8, %v608_v6  ;;  %v614_v11 = vsel %vm609_vm0, %v608_v6, %v606_v8 }
 0x1ed   : > { %v628_v12 = vmul.f32 %v621_v4, %v610_v10  ;;  %v629_v14 = vmul.f32 %v625_v5, %v614_v11  ;;  %v369_v4 = vld [vmem:[#allocation7] ss:$8 sm:$0x3]  ;;  %v403_v5 = vld [vmem:[#allocation7 + $0x1] ss:$8 sm:$0x3] }
 0x1ee   : > { %v378_v13 = vrot.slane %v369_v4, %v1285_v9  ;;  %v412_v15 = vrot.slane %v403_v5, %v1285_v9 }
 0x1ef   : > { %v538_v16 = vpop.permute.xlu1 %537  ;;  %v540_v17 = vpop.permute.xlu0 %539  ;;  %v908_v18 = vpack.c.bf16 %v629_v14, %v629_v14  ;;  %v907_v19 = vpack.c.bf16 %v628_v12, %v628_v12  ;;  %v374_v12 = vrot.slane %v369_v4, %v1283_v7  ;;  %v408_v14 = vrot.slane %v403_v5, %v1283_v7  ;;  %v639_v7 = vld [vmem:[%s1392_s2] sm:$0xf] }
 0x1f0   : > { %v542_v26 = vsel %vm541_vm2, %v538_v16, %v540_v17  ;;  %v546_v27 = vsel %vm541_vm2, %v540_v17, %v538_v16 }
 0x1f1   : > { %881 = vmatprep.subr.msk.bf16.mxu0 %vm698_vm1, %v908_v18  ;;  %v700_v22 = vsel %vm698_vm1, %v907_v19, 0  ;;  %v560_v34 = vmul.f32 %v553_v20, %v542_v26  ;;  %v561_v35 = vmul.f32 %v557_v21, %v546_v27 }
 0x1f2   : > { %712 = vmatpush1.bf16.msra.mxu0 %v700_v22 }
 0x1f3   : > { %v572_v28 = vpop.permute.xlu1 %571  ;;  %v574_v29 = vpop.permute.xlu0 %573 }
 0x1f4   : > { %v576_v30 = vsel %vm575_vm3, %v572_v28, %v574_v29  ;;  %v580_v31 = vsel %vm575_vm3, %v574_v29, %v572_v28 }
 0x1f5   : > { %v594_v36 = vmul.f32 %v587_v23, %v576_v30  ;;  %v595_v37 = vmul.f32 %v591_v24, %v580_v31 }
 0x1f7   : > { %v504_v38 = vpop.permute.xlu1 %503  ;;  %v506_v39 = vpop.permute.xlu0 %505  ;;  %v906_v40 = vpack.c.bf16 %v595_v37, %v561_v35  ;;  %v905_v41 = vpack.c.bf16 %v594_v36, %v560_v34 }
 0x1f8   : > { %v508_v42 = vsel %vm507_vm4, %v504_v38, %v506_v39  ;;  %v512_v43 = vsel %vm507_vm4, %v506_v39, %v504_v38 }
 0x1f9   : > { %v526_v44 = vmul.f32 %v519_v32, %v508_v42  ;;  %v527_v45 = vmul.f32 %v523_v33, %v512_v43  ;;  %713 = vmatprep.subr.bf16.mxu0 %v906_v40 }
 0x1fa   : > { %714 = vmatpush1.bf16.msra.mxu0 %v905_v41 }
 0x1fb   : > { %v427_v50 = vpop.permute.xlu1 %426  ;;  %v430_v51 = vpop.permute.xlu0 %429  ;;  %v904_v52 = vpack.c.bf16 %v527_v45, %v1307_v2  ;;  %v903_v53 = vpack.c.bf16 %v526_v44, %v1305_v1 }
 0x1fc   : > { %v432_v58 = vsel %vm431_vm5, %v430_v51, %v427_v50  ;;  %v435_v59 = vsel %vm431_vm5, %v427_v50, %v430_v51 }
 0x1fd   : > { %715 = vmatprep.subr.bf16.mxu0 %v904_v52  ;;  %v449_v0 = vmul.f32 %v442_v54, %v435_v59  ;;  %v450_v2 = vmul.f32 %v446_v55, %v432_v58 }
 0x1fe   : > { %716 = vmatpush1.bf16.msra.mxu0 %v903_v53 }
 0x1ff   : > { %v461_v60 = vpop.permute.xlu1 %460  ;;  %v464_v61 = vpop.permute.xlu0 %463 }
 0x200   : > { %v466_v62 = vsel %vm465_vm6, %v464_v61, %v461_v60  ;;  %v469_v63 = vsel %vm465_vm6, %v461_v60, %v464_v61 }
 0x201   : > { %v483_v1 = vmul.f32 %v476_v56, %v469_v63  ;;  %v484_v3 = vmul.f32 %v480_v57, %v466_v62 }
 0x203   : > { %v359_v6 = vpop.permute.xlu1 %358  ;;  %v363_v8 = vpop.permute.xlu0 %362  ;;  %v902_v10 = vpack.c.bf16 %v484_v3, %v450_v2  ;;  %v901_v11 = vpack.c.bf16 %v483_v1, %v449_v0 }
 0x204   : > { %v365_v16 = vsel %vm364_vm7, %v363_v8, %v359_v6  ;;  %v368_v17 = vsel %vm364_vm7, %v359_v6, %v363_v8 }
 0x205   : > { %717 = vmatprep.subr.bf16.mxu0 %v902_v10  ;;  %v381_v22 = vmul.f32 %v374_v12, %v368_v17  ;;  %v382_v23 = vmul.f32 %v378_v13, %v365_v16 }
 0x206   : > { %718 = vmatpush1.bf16.msra.mxu0 %v901_v11 }
 0x207   : > { %v393_v18 = vpop.permute.xlu1 %392  ;;  %v396_v19 = vpop.permute.xlu0 %395 }
 0x208   : > { %v398_v20 = vsel %vm397_vm8, %v396_v19, %v393_v18  ;;  %v401_v21 = vsel %vm397_vm8, %v393_v18, %v396_v19 }
 0x209   : > { %v415_v24 = vmul.f32 %v408_v14, %v401_v21  ;;  %v416_v25 = vmul.f32 %v412_v15, %v398_v20 }
 0x20b   : > { %v900_v26 = vpack.c.bf16 %v416_v25, %v382_v23  ;;  %v899_v27 = vpack.c.bf16 %v415_v24, %v381_v22 }
 0x20d   : > { %719 = vmatprep.subr.bf16.mxu0 %v900_v26 }
 0x20e   : > { %720 = vmatpush1.bf16.msra.mxu0 %v899_v27 }
 0x211   : > { %882 = vmatmul.mubr.msk.bf16.vlgmr.msra.gmra.mxu0 %vm694_vm9, %v639_v7 }
 0x2d1   : > { %v739_v9 = vpop.f32.mrf.mxu0 }
 0x2d2   : > { %987 = vtanh.f32 %v739_v9 }
 0x2d3   : > { %v741_v28 = vpop.f32.mrf.mxu0 }
 0x2d4   : > { %989 = vtanh.f32 %v741_v28 }
 0x2d5   : > { %v743_v29 = vpop.f32.mrf.mxu0 }
 0x2d7   : > { %v744_v30 = vpop.f32.mrf.mxu0 }
 0x2df   : > { %v988_v31 = vpop.eup %987 }
 0x2e0   : > { %v750_v32 = vadd.f32 %v988_v31, %v1293_v48 }
 0x2e1   : > { %v990_v33 = vpop.eup %989 }
 0x2e2   : > { %991 = vtanh.f32 %v750_v32  ;;  %v751_v34 = vadd.f32 %v990_v33, %v1295_v49 }
 0x2e4   : > { %993 = vtanh.f32 %v751_v34 }
 0x2ef   : > { %v992_v35 = vpop.eup %991 }
 0x2f0   : > { %754 = vst [vmem:[%s228_s5] sm:$0xff] %v992_v35 }
 0x2f1   : > { %v994_v36 = vpop.eup %993 }
 0x2f2   : > { %755 = vst [vmem:[%s228_s5 + $0x8] sm:$0xff] %v994_v36 }
 0x2f3   : > { %1062 = shalt.err (!%p1059_p0)
}
 0x2f4   : > { %s1063_s8 = scalar_lea.hbm %s1353_s21, 256  ;;  %s1067_s13 = scalar_lea.hbm %s1394_s4, 512 }
 0x2f5   : > { %p1064_p5 = scmp.ne.s32.totalorder %s1353_s21, %s1063_s8  ;;  %p1068_p1 = scmp.lt.s32.totalorder %s1353_s21, %s1394_s4 }
 0x2f6   : > { %p1069_p4 = scmp.lt.s32.totalorder %s1067_s13, %s1063_s8 }
 0x2f7   : > { %p1065_p9 = pnand %p1064_p5, %p1410_p3 }
 0x2f8   : > { %p1070_p6 = por %p1069_p4, %p1068_p1 }
 0x2f9   : > { %p1066_p12 = pneg %p1065_p9 }
 0x2fb   : > { %p1071_p8 = pnand %p1070_p6, %p1066_p12 }
 0x2fd   : > { %1074 = shalt.err (!%p1071_p8)
}
 0x2fe   : > { %915 = dma.vmem_to_hbm [thread:$0]  (%p1410_p3), %s772_s6, 256, %s1353_s21, %s757_s26  }
 0x2ff PF: > { %s783_s20 = sand.u32 1, %s1105_s15   ;;  %p1411_p11 = scmp.ne.s32.totalorder %s1400_s22, 0 }
 0x300   : > { %p1412_p7 = scmp.ge.s32.totalorder %s1117_s18, 2  ;;  %s784_s30 = scalar_lea.sflag [#allocation6], %s783_s20 }
 0x302   : > { %p926_p10 = pnand %p1412_p7, %p1411_p11 }
 0x304   : > { %p927_p2 = pneg %p926_p10 }
 0x306   : > { %1100 = dma.done.wait (%p927_p2), %s784_s30, 256  }
 0x307   : > { %1102 = vsyncadd (%p927_p2), %s784_s30, 4294967040  ;;  %p18_p13 = scmp.ge.s32.totalorder %s1215_s27, 4   ;;  %s1413_s15 = smov %s1109_s16 }
 0x308   : > { %s1414_s16 = smov %s1113_s17  ;;  %s1415_s17 = smov %s1232_s9 }
 0x309   : > { %s1416_s18 = smov %s1215_s27  ;;  %20 = sbr.rel (!%p18_p13) target bundleno = 6 (0x6), region = 92 }
 0x30e   :  { %789 = vsyncpa [#allocation5], 1 }
 0x30f   :  { %791 = vsyncpa [#allocation5 + $0x1], 1 }
 0x310   :  { %792 = vsyncpa [#allocation8], 1 }
 0x311   :  { %793 = vsyncpa [#allocation6], 1 }
 0x312   :  { %795 = vsyncpa [#allocation6 + $0x1], 1 }

</bundles_post_ra>
